<compile_context>
chip_gen: v7x
topology: tpu7x:2x2x1
jax: 0.10.0
libtpu: 0.0.40
codegen_flags: <defaults>
</compile_context>

<pallas_src>
import functools

import jax
import jax.numpy as jnp
from jax.experimental import pallas as pl
from jax.experimental.pallas import tpu as pltpu


def _gate_kernel(xl_ref, xr_ref, w1t_ref, b1_ref, w2_ref, out_ref, *, head2_on_mxu):
    # xl_ref, xr_ref : (C, P)    pixel tiles (lane axis = pixels)
    # w1t_ref        : (Hq, C)   first 1x1 conv weight, already transposed
    # b1_ref         : (Hq, 1)   first conv bias (lane-broadcast)
    # w2_ref         : (1, Hq) if head2_on_mxu else (Hq, 1)
    # out_ref        : (2, P)    row 0 = left weight, row 1 = right weight
    w1t = w1t_ref[...]
    b1 = b1_ref[...]

    # Two dots against the same small stationary weight — no (C, 2P) concat copy.
    h_l = jnp.maximum(
        jnp.dot(w1t, xl_ref[...], preferred_element_type=jnp.float32) + b1, 0.0)
    h_r = jnp.maximum(
        jnp.dot(w1t, xr_ref[...], preferred_element_type=jnp.float32) + b1, 0.0)

    if head2_on_mxu:
        # Large Hq: route the (1, Hq) x (Hq, P) reduction through the MXU
        # instead of a multi-vreg cross-sublane (XLU) reduce.
        w2row = w2_ref[...]                                              # (1, Hq)
        z_l = jnp.dot(w2row, h_l, preferred_element_type=jnp.float32)   # (1, P)
        z_r = jnp.dot(w2row, h_r, preferred_element_type=jnp.float32)
    else:
        # Small Hq: broadcast multiply + sublane reduce is cheaper.
        w2col = w2_ref[...]                                              # (Hq, 1)
        z_l = jnp.sum(h_l * w2col, axis=0, keepdims=True)                # (1, P)
        z_r = jnp.sum(h_r * w2col, axis=0, keepdims=True)

    # NOTE: b2 is intentionally never loaded — a bias shared by both logits
    # cancels exactly in the 2-way softmax.
    # softmax over the 2 logits == sigmoid of their difference.
    d = z_l - z_r
    # exp + approximate reciprocal both run on the otherwise-idle EUP slot
    # (no exact f32 divide on the VALU).
    wl = pl.reciprocal(1.0 + jnp.exp(-d), approx=True)                   # (1, P)

    out_ref[0:1, :] = wl.astype(out_ref.dtype)
    out_ref[1:2, :] = (1.0 - wl).astype(out_ref.dtype)


def _pick_pixel_tile(hw_pad, batch, c, itemsize, target_input_bytes, min_steps):
    """Largest pixel tile P (multiple of 128, divisor of hw_pad) such that
    (a) the double-buffered input footprint 2 inputs x 2 bufs x C x P x itemsize
        stays within `target_input_bytes` (HBM-roofline-sized, VMEM-safe on
        v5e/v6e/v7x), and
    (b) the grid keeps >= min_steps steps for pipelining / megacore sharding."""
    assert hw_pad % 128 == 0
    q = hw_pad // 128
    budget_p = max(128, target_input_bytes // (4 * c * itemsize))
    steps_p = 128 * max(1, (batch * q) // min_steps)
    upper = min(budget_p, steps_p)

    best = 128
    for i in range(1, int(q ** 0.5) + 1):
        if q % i == 0:
            for d in (i, q // i):
                p = 128 * d
                if best < p <= upper:
                    best = p
    return best


def channel_weight_gate(l_ch, r_ch, w1, b1, w2, b2=None, *,
                        pixel_tile=None,
                        target_input_bytes=8 << 20,
                        min_grid_steps=8):
    """l_ch, r_ch: [B, C, H, W] (NCHW, like the PyTorch module), f32 or bf16.
    Weights as (Cin, Cout) matrices: w1 (C, C//4), b1 (C//4,) or (1, C//4),
    w2 (C//4, 1).  b2 is accepted but unused (it cancels in the 2-way softmax).
    Returns [B, 2, H, W] float32."""
    B, C, H, W = l_ch.shape
    assert r_ch.shape == (B, C, H, W)
    assert C % 4 == 0, "in_dim must be divisible by 4"
    Hq = C // 4
    HW = H * W

    # NCHW -> (B, C, HW): a pure reshape, no transpose, no extra HBM pass.
    xl = l_ch.reshape(B, C, HW)
    xr = r_ch.reshape(B, C, HW)

    # Pad the pixel axis once to a multiple of 128 so every vld/vst is
    # full-width (only matters for odd spatial sizes).
    HW_pad = ((HW + 127) // 128) * 128
    if HW_pad != HW:
        pad = HW_pad - HW
        xl = jnp.pad(xl, ((0, 0), (0, 0), (0, pad)))
        xr = jnp.pad(xr, ((0, 0), (0, 0), (0, pad)))

    itemsize = jnp.dtype(xl.dtype).itemsize
    if pixel_tile is None:
        pixel_tile = _pick_pixel_tile(HW_pad, B, C, itemsize,
                                      target_input_bytes, min_grid_steps)
    assert HW_pad % pixel_tile == 0 and pixel_tile % 128 == 0

    # Weights are tiny; match the input dtype for the MXU operands (bf16 is the
    # native single-pass width), keep post-matmul elementwise math in f32.
    w1t = jnp.transpose(w1).astype(xl.dtype)          # (Hq, C)
    b1c = b1.reshape(Hq, 1).astype(jnp.float32)       # (Hq, 1)
    head2_on_mxu = Hq >= 32
    w2c = (w2.reshape(1, Hq) if head2_on_mxu else w2.reshape(Hq, 1)).astype(jnp.float32)
    # b2 is never passed to the kernel.

    grid = (B, HW_pad // pixel_tile)

    n_pix = B * HW_pad
    cost = pl.CostEstimate(
        flops=2 * (2 * n_pix * C * Hq) + 2 * (2 * n_pix * Hq) + 6 * n_pix,
        transcendentals=2 * n_pix,                     # exp + approx reciprocal
        bytes_accessed=(2 * n_pix * C * itemsize       # both inputs
                        + 2 * n_pix * 4                # output
                        + (w1t.size * itemsize + (b1c.size + w2c.size) * 4)),
    )

    kernel = functools.partial(_gate_kernel, head2_on_mxu=head2_on_mxu)

    out = pl.pallas_call(
        kernel,
        out_shape=jax.ShapeDtypeStruct((B, 2, HW_pad), jnp.float32),
        grid_spec=pltpu.PrefetchScalarGridSpec(
            num_scalar_prefetch=0,
            grid=grid,
            in_specs=[
                pl.BlockSpec((None, C, pixel_tile), lambda b, p: (b, 0, p)),  # xl
                pl.BlockSpec((None, C, pixel_tile), lambda b, p: (b, 0, p)),  # xr
                pl.BlockSpec(w1t.shape, lambda b, p: (0, 0)),                 # w1^T
                pl.BlockSpec(b1c.shape, lambda b, p: (0, 0)),                 # b1
                pl.BlockSpec(w2c.shape, lambda b, p: (0, 0)),                 # w2
            ],
            out_specs=pl.BlockSpec((None, 2, pixel_tile), lambda b, p: (b, 0, p)),
        ),
        compiler_params=pltpu.CompilerParams(
            dimension_semantics=("parallel", "parallel"),
            vmem_limit_bytes=32 << 20),
        cost_estimate=cost,
    )(xl, xr, w1t, b1c, w2c)

    if HW_pad != HW:
        out = out[:, :, :HW]
    # (B, 2, HW) -> [B, 2, H, W]: reshape only, no transpose.
    return out.reshape(B, 2, H, W)


def _reference(l_ch, r_ch, w1, b1, w2, b2):
    """Pure-JAX reference matching the PyTorch forward (includes b2)."""
    def fc(x):  # x: [B, C, H, W]
        h = jnp.einsum('bchw,cd->bdhw', x, w1) + b1.reshape(1, -1, 1, 1)
        h = jnp.maximum(h, 0.0)
        z = jnp.einsum('bdhw,de->behw', h, w2) + b2.reshape(1, -1, 1, 1)
        return z  # [B, 1, H, W]
    logits = jnp.concatenate([fc(l_ch), fc(r_ch)], axis=1)
    return jax.nn.softmax(logits, axis=1)


if __name__ == "__main__":
    # Small shapes consistent with the module (in_dim must be divisible by 4).
    B, C, H, W = 2, 32, 16, 16
    Hq = C // 4

    key = jax.random.PRNGKey(0)
    k1, k2, k3, k4, k5, k6 = jax.random.split(key, 6)

    l_ch = jax.random.normal(k1, (B, C, H, W), dtype=jnp.float32)
    r_ch = jax.random.normal(k2, (B, C, H, W), dtype=jnp.float32)

    # Conv2d 1x1 weights stored as (Cin, Cout) matrices (transpose of PyTorch's
    # (Cout, Cin, 1, 1) layout — transpose when loading real checkpoints).
    w1 = jax.random.normal(k3, (C, Hq), dtype=jnp.float32) * 0.1
    b1 = jax.random.normal(k4, (1, Hq), dtype=jnp.float32) * 0.1
    w2 = jax.random.normal(k5, (Hq, 1), dtype=jnp.float32) * 0.1
    b2 = jax.random.normal(k6, (1, 1), dtype=jnp.float32) * 0.1

    ref = _reference(l_ch, r_ch, w1, b1, w2, b2)

    # f32 activations.
    out = channel_weight_gate(l_ch, r_ch, w1, b1, w2, b2)
    out = jax.block_until_ready(out)
    assert out.shape == (B, 2, H, W)
    # Tolerance accounts for the EUP approximate reciprocal in the sigmoid
    # (error well below 1e-3 on a [0,1] gate output).
    assert jnp.allclose(out, ref, atol=2e-3, rtol=0), \
        float(jnp.max(jnp.abs(out - ref)))

    # bf16 activations (halves input HBM bytes; matmul still accumulates f32).
    out_bf16 = channel_weight_gate(l_ch.astype(jnp.bfloat16),
                                   r_ch.astype(jnp.bfloat16),
                                   w1, b1, w2, b2)
    out_bf16 = jax.block_until_ready(out_bf16)
    assert jnp.allclose(out_bf16, ref, atol=2e-2, rtol=0), \
        float(jnp.max(jnp.abs(out_bf16 - ref)))

    print("KERNEL_OK")
</pallas_src>

<mosaic_0001>
module attributes {stable_mosaic.version = 11 : i64} {
  func.func @_gate_kernel(%arg0: i32, %arg1: i32, %arg2: memref<1x32x128xf32, #tpu.memory_space<vmem>>, %arg3: memref<1x32x128xf32, #tpu.memory_space<vmem>>, %arg4: memref<8x32xf32, #tpu.memory_space<vmem>>, %arg5: memref<8x1xf32, #tpu.memory_space<vmem>>, %arg6: memref<8x1xf32, #tpu.memory_space<vmem>>, %arg7: memref<1x2x128xf32, #tpu.memory_space<vmem>>) attributes {dimension_semantics = [#tpu.dimension_semantics<parallel>, #tpu.dimension_semantics<parallel>], iteration_bounds = array<i64: 2, 2>, scalar_prefetch = 0 : i64, scratch_operands = 0 : i64, tpu.core_type = #tpu.core_type<tc>, window_params = [{transform_indices = @transform_0, window_bounds = array<i64: 1, 32, 128>}, {transform_indices = @transform_1, window_bounds = array<i64: 1, 32, 128>}, {pipeline_mode = #tpu.pipeline_mode<synchronous>, transform_indices = @transform_2, window_bounds = array<i64: 8, 32>}, {pipeline_mode = #tpu.pipeline_mode<synchronous>, transform_indices = @transform_3, window_bounds = array<i64: 8, 1>}, {pipeline_mode = #tpu.pipeline_mode<synchronous>, transform_indices = @transform_4, window_bounds = array<i64: 8, 1>}, {transform_indices = @transform_5, window_bounds = array<i64: 1, 2, 128>}]} {
    %c0 = arith.constant 0 : index
    %c0_0 = arith.constant 0 : index
    %0 = vector.load %arg4[%c0, %c0_0] : memref<8x32xf32, #tpu.memory_space<vmem>>, vector<8x32xf32>
    %c0_1 = arith.constant 0 : index
    %c0_2 = arith.constant 0 : index
    %1 = vector.load %arg5[%c0_1, %c0_2] : memref<8x1xf32, #tpu.memory_space<vmem>>, vector<8x1xf32>
    %c0_3 = arith.constant 0 : index
    %c0_4 = arith.constant 0 : index
    %c0_5 = arith.constant 0 : index
    %2 = vector.load %arg2[%c0_3, %c0_4, %c0_5] : memref<1x32x128xf32, #tpu.memory_space<vmem>>, vector<1x32x128xf32>
    %3 = vector.shape_cast %2 : vector<1x32x128xf32> to vector<32x128xf32>
    %cst = arith.constant dense<0.000000e+00> : vector<8x128xf32>
    %4 = tpu.matmul %0, %3, %cst {dimension_numbers = #tpu.dot_dimension_numbers<[1], [0], [0], [1], [0, 0, 1, 1], [], []>} : vector<8x32xf32>, vector<32x128xf32>, vector<8x128xf32> -> vector<8x128xf32>
    %5 = vector.broadcast %1 : vector<8x1xf32> to vector<8x128xf32>
    %6 = arith.addf %4, %5 : vector<8x128xf32>
    %cst_6 = arith.constant 0.000000e+00 : f32
    %7 = vector.broadcast %cst_6 : f32 to vector<8x128xf32>
    %8 = arith.maximumf %6, %7 : vector<8x128xf32>
    %c0_7 = arith.constant 0 : index
    %c0_8 = arith.constant 0 : index
    %c0_9 = arith.constant 0 : index
    %9 = vector.load %arg3[%c0_7, %c0_8, %c0_9] : memref<1x32x128xf32, #tpu.memory_space<vmem>>, vector<1x32x128xf32>
    %10 = vector.shape_cast %9 : vector<1x32x128xf32> to vector<32x128xf32>
    %cst_10 = arith.constant dense<0.000000e+00> : vector<8x128xf32>
    %11 = tpu.matmul %0, %10, %cst_10 {dimension_numbers = #tpu.dot_dimension_numbers<[1], [0], [0], [1], [0, 0, 1, 1], [], []>} : vector<8x32xf32>, vector<32x128xf32>, vector<8x128xf32> -> vector<8x128xf32>
    %12 = vector.broadcast %1 : vector<8x1xf32> to vector<8x128xf32>
    %13 = arith.addf %11, %12 : vector<8x128xf32>
    %cst_11 = arith.constant 0.000000e+00 : f32
    %14 = vector.broadcast %cst_11 : f32 to vector<8x128xf32>
    %15 = arith.maximumf %13, %14 : vector<8x128xf32>
    %c0_12 = arith.constant 0 : index
    %c0_13 = arith.constant 0 : index
    %16 = vector.load %arg6[%c0_12, %c0_13] : memref<8x1xf32, #tpu.memory_space<vmem>>, vector<8x1xf32>
    %17 = vector.broadcast %16 : vector<8x1xf32> to vector<8x128xf32>
    %18 = arith.mulf %8, %17 : vector<8x128xf32>
    %cst_14 = arith.constant dense<0.000000e+00> : vector<128xf32>
    %19 = vector.multi_reduction <add>, %18, %cst_14 [0] : vector<8x128xf32> to vector<128xf32>
    %20 = vector.shape_cast %19 : vector<128xf32> to vector<1x128xf32>
    %21 = vector.broadcast %16 : vector<8x1xf32> to vector<8x128xf32>
    %22 = arith.mulf %15, %21 : vector<8x128xf32>
    %cst_15 = arith.constant dense<0.000000e+00> : vector<128xf32>
    %23 = vector.multi_reduction <add>, %22, %cst_15 [0] : vector<8x128xf32> to vector<128xf32>
    %24 = vector.shape_cast %23 : vector<128xf32> to vector<1x128xf32>
    %25 = arith.subf %20, %24 : vector<1x128xf32>
    %cst_16 = arith.constant 0.000000e+00 : f32
    %26 = vector.broadcast %cst_16 : f32 to vector<1x128xf32>
    %27 = arith.subf %26, %25 : vector<1x128xf32>
    %28 = math.exp %27 : vector<1x128xf32>
    %cst_17 = arith.constant 1.000000e+00 : f32
    %29 = vector.broadcast %cst_17 : f32 to vector<1x128xf32>
    %30 = arith.addf %29, %28 : vector<1x128xf32>
    %31 = tpu.reciprocal %30 {approx = true} : vector<1x128xf32> -> vector<1x128xf32>
    %c0_18 = arith.constant 0 : index
    %c0_19 = arith.constant 0 : index
    %c0_20 = arith.constant 0 : index
    %32 = vector.load %arg7[%c0_18, %c0_19, %c0_20] : memref<1x2x128xf32, #tpu.memory_space<vmem>>, vector<1x1x128xf32>
    %33 = vector.shape_cast %32 : vector<1x1x128xf32> to vector<1x128xf32>
    %34 = vector.shape_cast %31 : vector<1x128xf32> to vector<1x1x128xf32>
    tpu.vector_store %arg7[%c0_18, %c0_19, %c0_20], %34 {strides = array<i32>} : memref<1x2x128xf32, #tpu.memory_space<vmem>>, vector<1x1x128xf32>,
    %cst_21 = arith.constant 1.000000e+00 : f32
    %35 = vector.broadcast %cst_21 : f32 to vector<1x128xf32>
    %36 = arith.subf %35, %31 : vector<1x128xf32>
    %c0_22 = arith.constant 0 : index
    %c1 = arith.constant 1 : index
    %c0_23 = arith.constant 0 : index
    %37 = vector.load %arg7[%c0_22, %c1, %c0_23] : memref<1x2x128xf32, #tpu.memory_space<vmem>>, vector<1x1x128xf32>
    %38 = vector.shape_cast %37 : vector<1x1x128xf32> to vector<1x128xf32>
    %39 = vector.shape_cast %36 : vector<1x128xf32> to vector<1x1x128xf32>
    tpu.vector_store %arg7[%c0_22, %c1, %c0_23], %39 {strides = array<i32>} : memref<1x2x128xf32, #tpu.memory_space<vmem>>, vector<1x1x128xf32>,
    return
  }
  func.func @transform_0(%arg0: i32, %arg1: i32) -> (i32, i32, i32) {
    %c0_i32 = arith.constant 0 : i32
    %c0_i32_0 = arith.constant 0 : i32
    return %arg0, %c0_i32, %arg1 : i32, i32, i32
  }
  func.func @transform_1(%arg0: i32, %arg1: i32) -> (i32, i32, i32) {
    %c0_i32 = arith.constant 0 : i32
    %c0_i32_0 = arith.constant 0 : i32
    return %arg0, %c0_i32, %arg1 : i32, i32, i32
  }
  func.func @transform_2(%arg0: i32, %arg1: i32) -> (i32, i32) {
    %c0_i32 = arith.constant 0 : i32
    %c0_i32_0 = arith.constant 0 : i32
    %c0_i32_1 = arith.constant 0 : i32
    return %c0_i32, %c0_i32_0 : i32, i32
  }
  func.func @transform_3(%arg0: i32, %arg1: i32) -> (i32, i32) {
    %c0_i32 = arith.constant 0 : i32
    %c0_i32_0 = arith.constant 0 : i32
    %c0_i32_1 = arith.constant 0 : i32
    return %c0_i32, %c0_i32_0 : i32, i32
  }
  func.func @transform_4(%arg0: i32, %arg1: i32) -> (i32, i32) {
    %c0_i32 = arith.constant 0 : i32
    %c0_i32_0 = arith.constant 0 : i32
    %c0_i32_1 = arith.constant 0 : i32
    return %c0_i32, %c0_i32_0 : i32, i32
  }
  func.func @transform_5(%arg0: i32, %arg1: i32) -> (i32, i32, i32) {
    %c0_i32 = arith.constant 0 : i32
    %c0_i32_0 = arith.constant 0 : i32
    return %arg0, %c0_i32, %arg1 : i32, i32, i32
  }
}

</mosaic_0001>

<bundles_post_ra>
// kernel: tpu_custom_call.1
= control target key start
LH: loop header
LB: loop body
LE: loop exit
PB: predicated region body
PF: predicated region fallthrough
CT: control target
= control target key end

     0   :  { %s1250_s0 = inlined_call_operand.hbm [shape: f32[2,32,256], index: 0, kind: input, shape index: {}]   ;;  %s1251_s1 = inlined_call_operand.hbm [shape: f32[2,32,256], index: 1, kind: input, shape index: {}]   ;;  %s1252_s2 = inlined_call_operand.vmem [shape: f32[8,32], index: 2, kind: input, shape index: {}]   ;;  %s1253_s3 = inlined_call_operand.vmem [shape: f32[8,1], index: 3, kind: input, shape index: {}]   ;;  %s1254_s4 = inlined_call_operand.vmem [shape: f32[8,1], index: 4, kind: input, shape index: {}]   ;;  %s1255_s5 = inlined_call_operand.hbm [shape: f32[2,2,256], index: 5, kind: output, shape index: {}]  }
   0x1   :  { %1264 = sst [smem:[#allocation16_spill]] %s1250_s0 }
   0x2   :  { %10 = vsyncpa [#allocation3], 0 }
   0x3   :  { %12 = vsyncpa [#allocation3 + $0x1], 0 }
   0x4   :  { %13 = vsyncpa [#allocation6], 0 }
   0x5   :  { %15 = vsyncpa [#allocation6 + $0x1], 0 }
   0x6   :  { %16 = vsyncpa [#allocation4], 0 }
   0x7   :  { %18 = vsyncpa [#allocation4 + $0x1], 0  ;;  %s983_s18 = smov 0   ;;  %s985_s19 = smov 0  }
   0x8   :  { %s987_s20 = smov 0   ;;  %s989_s21 = smov 0  }
   0x9   :  { %s991_s22 = smov 0   ;;  %s993_s23 = smov 0  }
   0xa   :  { %s995_s24 = smov 0   ;;  %s997_s25 = smov 0  }
   0xb LB: > { %1265 = sst [smem:[#allocation11_spill]] %s933_s23  ;;  %s619_s26 = sadd.s32 4294967295, %s941_s25   ;;  %s941_s25 = sphi %s997_s25, %s24_s25   ;;  %s937_s24 = sphi %s995_s24, %s1287_s24   ;;  %s933_s23 = sphi %s993_s23, %s1286_s23   ;;  %s929_s22 = sphi %s991_s22, %s1285_s22   ;;  %s925_s21 = sphi %s989_s21, %s1284_s21   ;;  %s921_s20 = sphi %s987_s20, %s1290_s20   ;;  %s917_s19 = sphi %s985_s19, %s1289_s19   ;;  %s913_s18 = sphi %s983_s18, %s1288_s18  }
   0xc   : > { %1266 = sst [smem:[#allocation12_spill]] %s937_s24  ;;  %s620_s27 = sadd.s32 4294967294, %s941_s25  }
   0xd   : > { %s33_s28 = sadd.s32 1, %s933_s23  ;;  %s36_s29 = sadd.s32 1, %s937_s24 }
   0xe   : > { %p34_p0 = scmp.ge.s32.totalorder %s33_s28, 2  ;;  %s45_s30 = sadd.s32 1, %s921_s20 }
   0xf   : > { %p52_p1 = scmp.ne.s32.totalorder %s921_s20, %s917_s19  ;;  %p53_p2 = scmp.eq.s32.totalorder %s941_s25, 0 }
  0x10   : > { %s1292_s28 = smov (%p34_p0, %s33_s28), 0  ;;  %s1294_s29 = smov (!%p34_p0, %s36_s29), %s937_s24 }
  0x11   : > { %1267 = sst [smem:[#allocation13_spill]] %s1292_s28  ;;  %s41_s6 = ssub.s32 %s933_s23, %s1292_s28 }
  0x12   : > { %p1036_p3 = por %p53_p2, %p52_p1  ;;  %p38_p4 = scmp.ge.s32.totalorder %s1294_s29, 2 }
  0x13   : > { %p58_p5 = scmp.ne.s32.totalorder %s917_s19, %s913_s18  ;;  %p59_p6 = scmp.eq.s32.totalorder %s619_s26, 0 }
  0x14   : > { %p175_p7 = scmp.eq.s32.totalorder %s619_s26, 3  ;;  %s1296_s29 = smov (%p38_p4, %s1294_s29), 0 }
  0x15   : > { %1269 = sst [smem:[#allocation14_spill]] %s1296_s29  ;;  %p1044_p8 = por %p59_p6, %p58_p5 }
  0x16   : > { %p1048_p9 = por %p175_p7, %p52_p1  ;;  %s40_s10 = ssub.s32 %s937_s24, %s1296_s29 }
  0x17   : > { %s1270_s8 = scalar_select %p1044_p8, 1, 0 }
  0x18   : > { %s1271_s9 = scalar_select %p1048_p9, 1, 0 }
  0x19   : > { %p181_p10 = scmp.eq.s32.totalorder %s620_s27, 3  ;;  %s42_s11 = sor.u32 %s41_s6, %s40_s10 }
  0x1a   : > { %p43_p11 = scmp.eq.s32.totalorder %s42_s11, 0  ;;  %p701_p13 = scmp.lt.s32.totalorder %s941_s25, 4 }
  0x1b   : > { %p1054_p12 = por %p181_p10, %p58_p5  ;;  %s1060_s13 = sand.u32 1, %s921_s20  }
  0x1c   : > { %s1063_s14 = scalar_select %p43_p11, %s921_s20, %s45_s30  }
  0x1d   : > { %s1272_s12 = scalar_select %p1054_p12, 1, 0 }
  0x1e   : > { %1273 = sst [smem:[#allocation15_spill]] %s1063_s14  ;;  %s1257_s15 = sshll.u32 %s1060_s13, 5 }
  0x1f   : > { %s624_s16 = sshll.u32 %s937_s24, 3  ;;  %s214_s26 = scalar_lea.vmem [#allocation2], %s1257_s15 }
  0x20   : > { %s1068_s17 = sadd.s32 %s933_s23, %s624_s16  ;;  %s222_s27 = sshll.u32 %s214_s26, 4  ;;  %s1073_s27 = int_to_ptr.vmem [resolvable:$true] %s222_s27 }
  0x21   : > { %s1258_s6 = sshll.u32 %s1068_s17, 7  ;;  %s1274_s0 = sld [smem:[#allocation16_spill]] }
  0x22   : > { %p1084_p0 = pnand %p701_p13, %p1036_p3 }
  0x24   : > { %p781_p2 = pneg %p1084_p0 }
  0x27   : > { %s1080_s29 = scalar_lea.hbm %s1274_s0, %s1258_s6  ;;  %s784_s11 = scalar_lea.hbm %s1274_s0, 2048 }
  0x28   : > { %s779_s26 = scalar_lea.hbm %s1080_s29, 512  ;;  %p785_p3 = scmp.lt.u32.totalorder %s1080_s29, %s1274_s0 }
  0x29   : > { %p780_p1 = scmp.ne.s32.totalorder %s1080_s29, %s779_s26  ;;  %p786_p6 = scmp.lt.u32.totalorder %s784_s11, %s779_s26 }
  0x2a   : > { %p788_p10 = scmp.lt.u32.totalorder %s779_s26, %s1080_s29 }
  0x2b   : > { %p782_p4 = pnand %p781_p2, %p780_p1  ;;  %p787_p7 = por %p786_p6, %p785_p3 }
  0x2d   : > { %p783_p5 = pneg %p782_p4  ;;  %p789_p11 = por %p788_p10, %p787_p7 }
  0x2f   : > { %p790_p13 = pnand %p789_p11, %p783_p5 }
  0x31   : > { %793 = shalt.err (!%p790_p13)
}
  0x32   : > { %s794_s16 = scalar_lea.vmem %s1073_s27, 512  ;;  %s943_s7 = smov [#allocation2]  }
  0x33   : > { %p795_p1 = scmp.ne.s32.totalorder %s1073_s27, %s794_s16  ;;  %s799_s10 = sshll.u32 %s943_s7, 4  ;;  %s800_s10 = int_to_ptr.vmem [resolvable:$false] %s799_s10 }
  0x34   : > { %s801_s15 = scalar_lea.vmem %s800_s10, 1024  ;;  %p802_p9 = scmp.lt.s32.totalorder %s1073_s27, %s800_s10 }
  0x35   : > { %p797_p4 = pnand %p795_p1, %p781_p2  ;;  %p803_p3 = scmp.lt.s32.totalorder %s801_s15, %s794_s16 }
  0x37   : > { %p798_p12 = pneg %p797_p4  ;;  %p804_p6 = por %p803_p3, %p802_p9 }
  0x39   : > { %p805_p7 = pnand %p804_p6, %p798_p12 }
  0x3b   : > { %808 = shalt.err (!%p805_p7)
}
  0x3c   : > { %s944_s6 = smov 256   ;;  %s945_s26 = smov 128  }
  0x3d   : > { %s946_s11 = smov 8   ;;  %s1276_s16 = scalar_lea.sflag [#allocation3], %s1060_s13 }
  0x3e   : > { %693 = dma.hbm_to_vmem [thread:$0]  (!%p1084_p0), %s1080_s29, 512, %s1073_s27, %s1276_s16, %s944_s6, %s945_s26, %s946_s11  }
  0x3f   : > { %p629_p9 = scmp.ge.s32.totalorder %s941_s25, 1  ;;  %p252_p12 = scmp.lt.s32.totalorder %s941_s25, 5 }
  0x40   : > { %s1278_s10 = sshll.u32 %s1068_s17, 7  ;;  %s1279_s24 = sshll.u32 %s1060_s13, 5 }
  0x41   : > { %p1121_p5 = pnand %p629_p9, %p252_p12  ;;  %s1130_s28 = scalar_lea.hbm %s1251_s1, %s1278_s10 }
  0x42   : > { %s236_s23 = scalar_lea.vmem [#allocation5], %s1279_s24  ;;  %s233_s29 = scalar_lea.sflag [#allocation6], %s1060_s13 }
  0x43   : > { %s244_s14 = sshll.u32 %s236_s23, 4  ;;  %s809_s27 = scalar_lea.hbm %s1130_s28, 512  ;;  %s1134_s14 = int_to_ptr.vmem [resolvable:$true] %s244_s14 }
  0x44   : > { %p810_p10 = scmp.ne.s32.totalorder %s1130_s28, %s809_s27  ;;  %s814_s16 = scalar_lea.hbm %s1251_s1, 2048 }
  0x45   : > { %p815_p1 = scmp.lt.u32.totalorder %s1130_s28, %s1251_s1  ;;  %p816_p4 = scmp.lt.u32.totalorder %s814_s16, %s809_s27 }
  0x46   : > { %p812_p11 = pnand %p810_p10, %p781_p2  ;;  %p818_p6 = scmp.lt.u32.totalorder %s809_s27, %s1130_s28 }
  0x47   : > { %p817_p3 = por %p816_p4, %p815_p1 }
  0x48   : > { %p813_p13 = pneg %p812_p11 }
  0x49   : > { %p819_p7 = por %p818_p6, %p817_p3 }
  0x4b   : > { %p820_p9 = pnand %p819_p7, %p813_p13 }
  0x4d   : > { %823 = shalt.err (!%p820_p9)
}
  0x4e   : > { %s824_s23 = scalar_lea.vmem %s1134_s14, 512  ;;  %s947_s24 = smov [#allocation5]  }
  0x4f   : > { %p825_p12 = scmp.ne.s32.totalorder %s1134_s14, %s824_s23  ;;  %s829_s17 = sshll.u32 %s947_s24, 4  ;;  %s830_s17 = int_to_ptr.vmem [resolvable:$false] %s829_s17 }
  0x50   : > { %s831_s0 = scalar_lea.vmem %s830_s17, 1024  ;;  %p832_p8 = scmp.lt.s32.totalorder %s1134_s14, %s830_s17 }
  0x51   : > { %p827_p10 = pnand %p825_p12, %p781_p2  ;;  %p833_p1 = scmp.lt.s32.totalorder %s831_s0, %s824_s23 }
  0x53   : > { %p828_p11 = pneg %p827_p10  ;;  %p834_p4 = por %p833_p1, %p832_p8 }
  0x55   : > { %p835_p3 = pnand %p834_p4, %p828_p11 }
  0x57   : > { %838 = shalt.err (!%p835_p3)
}
  0x58   : > { %696 = dma.hbm_to_vmem [thread:$0]  (!%p1084_p0), %s1130_s28, 512, %s1134_s14, %s233_s29, %s944_s6, %s945_s26, %s946_s11  }
  0x59   : > { %256 = sbr.rel (%p1121_p5) target bundleno = 387 (0x183), region = 40  ;;  %s1168_s27 = sand.u32 (!%p1121_p5), 1, %s917_s19  }
  0x5a   : > { %s630_s16 = sshll.u32 (!%p1121_p5), %s1168_s27, 5  ;;  %s259_s10 = scalar_lea.sflag (!%p1121_p5), [#allocation3], %s1168_s27 }
  0x5b   : > { %s262_s30 = scalar_lea.vmem (!%p1121_p5), [#allocation2], %s630_s16  ;;  %p1280_p8 = scmp.ne.s32.totalorder (!%p1121_p5), %s1270_s8, 0 }
  0x60   : > { %900 = dma.done.wait (%p1280_p8), %s259_s10, 512  }
  0x61   : > { %902 = vsyncadd (%p1280_p8), %s259_s10, 4294966784  ;;  %s268_s28 = scalar_lea.sflag [#allocation6], %s1168_s27  ;;  %s271_s13 = scalar_lea.vmem [#allocation5], %s630_s16 }
  0x62   : > { %904 = dma.done.wait (%p1280_p8), %s268_s28, 512  }
  0x63   : > { %906 = vsyncadd (%p1280_p8), %s268_s28, 4294966784  ;;  %v948_v0 = vmov 0.0|0.0   ;;  %vm949_vm0 = vmmov 0   ;;  %v950_v1 = vmov 0.0   ;;  %v951_v2 = vmov 0   ;;  %v305_v3 = vld [vmem:[%s262_s30] sm:$0xff] }
  0x64   : > { %672 = vmatprep.subr.bf16.mxu0 %v948_v0  ;;  %678 = vmatprep.subr.bf16.mxu1 %v948_v0  ;;  %v306_v4 = vld [vmem:[%s262_s30 + $0x8] sm:$0xff]  ;;  %v389_v5 = vld [vmem:[%s271_s13] sm:$0xff]  ;;  %v307_v8 = vld [vmem:[%s262_s30 + $0x10] sm:$0xff]  ;;  %vm314_vm1 = vcmask 261120   ;;  %s632_s29 = sshll.u32 %s1168_s27, 1  ;;  %s636_s15 = sshll.u32 %s929_s22, 1 }
  0x65   : > { %658 = vmatprep.mubr.msk.f32.mxu0 %vm949_vm0, %v950_v1  ;;  %669 = vmatprep.mubr.msk.f32.mxu1 %vm949_vm0, %v950_v1  ;;  %v673_v6 = vpack.c.bf16 %v306_v4, %v305_v3  ;;  %v390_v7 = vld [vmem:[%s271_s13 + $0x8] sm:$0xff]  ;;  %v308_v9 = vld [vmem:[%s262_s30 + $0x18] sm:$0xff]  ;;  %v391_v11 = vld [vmem:[%s271_s13 + $0x10] sm:$0xff]  ;;  %s505_s23 = sadd.s32 %s925_s21, %s636_s15  ;;  %s302_s17 = scalar_lea.vmem [#allocation7], %s632_s29 }
  0x66   : > { %774 = vset.pattern.permute.xlu0 %v951_v2  ;;  %v679_v10 = vpack.c.bf16 %v390_v7, %v389_v5  ;;  %v392_v12 = vld [vmem:[%s271_s13 + $0x18] sm:$0xff]  ;;  %v676_v13 = vpack.c.bf16 %v308_v9, %v307_v8  ;;  %v304_v14 = vld [vmem:[%s1253_s3] sm:$0xff]  ;;  %s637_s24 = sshll.u32 %s505_s23, 5  ;;  %s509_s0 = sshll.u32 %s302_s17, 4  ;;  %s1198_s0 = int_to_ptr.vmem [resolvable:$true] %s509_s0 }
  0x67   : > { %674 = vmatpush3.bf16.msra.mxu0 %v673_v6  ;;  %v682_v15 = vpack.c.bf16 %v392_v12, %v391_v11  ;;  %311 = vperm.xlu0 %774, %v304_v14   ;;  %v464_v16 = vld [vmem:[%s1254_s4] sm:$0xff]  ;;  %s1196_s30 = scalar_lea.hbm %s1255_s5, %s637_s24  ;;  %s494_s28 = scalar_lea.sflag [#allocation4], %s1168_s27 }
  0x68   : > { %680 = vmatpush3.bf16.msra.mxu1 %v679_v10  ;;  %675 = vmatprep.subr.bf16.mxu0 %v948_v0  ;;  %v303_v17 = vld [vmem:[%s1252_s2] sm:$0xff]  ;;  %s839_s22 = scalar_lea.vmem %s1198_s0, 32  ;;  %p1281_p2 = scmp.ne.s32.totalorder %s1271_s9, 0 }
  0x69   : > { %681 = vmatprep.subr.bf16.mxu1 %v948_v0  ;;  %p840_p0 = scmp.ne.s32.totalorder %s1198_s0, %s839_s22  ;;  %s952_s21 = smov [#allocation7]  }
  0x6a   : > { %s843_s13 = sshll.u32 %s952_s21, 4  ;;  %s844_s13 = int_to_ptr.vmem [resolvable:$false] %s843_s13 }
  0x6b   : > { %677 = vmatpush3.bf16.msra.mxu0 %v676_v13  ;;  %467 = vperm.xlu0 %774, %v464_v16   ;;  %p841_p5 = pnand %p840_p0, %p1281_p2  ;;  %s845_s8 = scalar_lea.vmem %s844_s13, 64 }
  0x6c   : > { %683 = vmatpush3.bf16.msra.mxu1 %v682_v15  ;;  %p846_p6 = scmp.lt.s32.totalorder %s1198_s0, %s844_s13  ;;  %p847_p7 = scmp.lt.s32.totalorder %s845_s8, %s839_s22 }
  0x6d   : > { %p842_p13 = pneg %p841_p5 }
  0x6e   : > { %659 = vmatmul.mubr.msk.f32.vlgmr.msra.gmra.mrb[0].mxu0 %vm314_vm1, %v303_v17  ;;  %p848_p9 = por %p847_p7, %p846_p6 }
  0x6f   : > { %670 = vmatmul.mubr.msk.f32.vlgmr.msra.gmra.mrb[0].mxu1 %vm314_vm1, %v303_v17 }
  0x70   : > { %p849_p12 = pnand %p848_p9, %p842_p13 }
  0xe6   : > { %v312_v18 = vpop.permute.xlu0 %311 }
  0xea   : > { %v468_v26 = vpop.permute.xlu0 %467 }
 0x141   : > { %v384_v19 = vpop.f32.mrb[0].mxu0 }
 0x142   : > { %v385_v20 = vadd.f32 %v384_v19, %v312_v18  ;;  %v459_v21 = vpop.f32.mrb[0].mxu1  ;;  %v660_v22 = vpop.f32.mrb[1].mxu0 }
 0x143   : > { %v460_v23 = vadd.f32 %v459_v21, %v312_v18  ;;  %v671_v24 = vpop.f32.mrb[1].mxu1 }
 0x144   : > { %v388_v25 = vmax.f32 %v385_v20, 0.0 }
 0x145   : > { %v463_v27 = vmax.f32 %v460_v23, 0.0 }
 0x146   : > { %v470_v28 = vmul.f32 %v468_v26, %v388_v25 }
 0x147   : > { %v477_v29 = vmul.f32 %v468_v26, %v463_v27 }
 0x148   : > { %v471_v30 = vrot.slane %v470_v28, 4 }
 0x149   : > { %v478_v31 = vrot.slane %v477_v29, 4 }
 0x14a   : > { %v472_v32 = vadd.f32 %v471_v30, %v470_v28 }
 0x14b   : > { %v479_v33 = vadd.f32 %v478_v31, %v477_v29 }
 0x14c   : > { %v473_v34 = vrot.slane %v472_v32, 2 }
 0x14d   : > { %v480_v35 = vrot.slane %v479_v33, 2 }
 0x14e   : > { %v474_v36 = vadd.f32 %v473_v34, %v472_v32 }
 0x14f   : > { %v481_v37 = vadd.f32 %v480_v35, %v479_v33 }
 0x150   : > { %v475_v38 = vrot.slane %v474_v36, 1 }
 0x151   : > { %v482_v39 = vrot.slane %v481_v37, 1 }
 0x152   : > { %v476_v40 = vadd.f32 %v475_v38, %v474_v36 }
 0x153   : > { %v483_v41 = vadd.f32 %v482_v39, %v481_v37 }
 0x155   : > { %v484_v42 = vsub.f32 %v476_v40, %v483_v41 }
 0x157   : > { %v485_v43 = vsub.f32 0.0, %v484_v42 }
 0x159   : > { %v486_v44 = vmul.f32 1.442695, %v485_v43 }
 0x15b   : > { %775 = vpow2.f32 %v486_v44 }
 0x165   : > { %v776_v45 = vpop.eup %775 }
 0x166   : > { %v488_v46 = vadd.f32 1.0, %v776_v45 }
 0x168   : > { %777 = vrcp.f32 %v488_v46 }
 0x172   : > { %v778_v47 = vpop.eup %777 }
 0x173   : > { %490 = vst [vmem:[%s302_s17] sm:$0x1] %v778_v47  ;;  %v491_v48 = vsub.f32 1.0, %v778_v47 }
 0x175   : > { %492 = vst [vmem:[%s302_s17 + $0x1] sm:$0x1] %v491_v48 }
 0x176   : > { %852 = shalt.err (!%p849_p12)
}
 0x177   : > { %s853_s27 = scalar_lea.hbm %s1196_s30, 32  ;;  %s857_s26 = scalar_lea.hbm %s1255_s5, 128 }
 0x178   : > { %p854_p10 = scmp.ne.s32.totalorder %s1196_s30, %s853_s27  ;;  %p858_p4 = scmp.lt.u32.totalorder %s1196_s30, %s1255_s5 }
 0x179   : > { %p859_p3 = scmp.lt.u32.totalorder %s857_s26, %s853_s27  ;;  %p861_p0 = scmp.lt.u32.totalorder %s853_s27, %s1196_s30 }
 0x17a   : > { %p855_p11 = pnand %p854_p10, %p1281_p2 }
 0x17b   : > { %p860_p8 = por %p859_p3, %p858_p4 }
 0x17c   : > { %p856_p1 = pneg %p855_p11 }
 0x17d   : > { %p862_p5 = por %p861_p0, %p860_p8 }
 0x17f   : > { %p863_p13 = pnand %p862_p5, %p856_p1 }
 0x181   : > { %866 = shalt.err (!%p863_p13)
}
 0x182   : > { %688 = dma.vmem_to_hbm [thread:$0]  (%p1281_p2), %s1198_s0, 32, %s1196_s30, %s494_s28  }
 0x183 PF: > { %p702_p6 = scmp.ge.s32.totalorder %s941_s25, 2  ;;  %s521_s29 = sand.u32 1, %s913_s18  }
 0x184   : > { %p1282_p7 = scmp.ne.s32.totalorder %s1272_s12, 0  ;;  %s522_s15 = scalar_lea.sflag [#allocation4], %s521_s29 }
 0x186   : > { %p698_p9 = pnand %p702_p6, %p1282_p7 }
 0x188   : > { %908 = dma.done.wait (!%p698_p9), %s522_s15, 32  }
 0x189   : > { %910 = vsyncadd (!%p698_p9), %s522_s15, 4294967264  ;;  %s24_s25 = sadd.s32 1, %s941_s25   ;;  %s1283_s9 = sld [smem:[#allocation15_spill]] }
 0x18a   : > { %p21_p12 = scmp.ge.s32.totalorder %s24_s25, 6   ;;  %s1284_s21 = sld [smem:[#allocation11_spill]] }
 0x18b   : > { %s1285_s22 = sld [smem:[#allocation12_spill]]  ;;  %s1286_s23 = sld [smem:[#allocation13_spill]] }
 0x18c   : > { %s1287_s24 = sld [smem:[#allocation14_spill]]  ;;  %s1288_s18 = smov %s917_s19 }
 0x18d   : > { %s1289_s19 = smov %s921_s20  ;;  %23 = sbr.rel (!%p21_p12) target bundleno = 11 (0xb), region = 98 }
 0x18f   : > { %s1290_s20 = smov %s1283_s9 }
 0x194   :  { %527 = vsyncpa [#allocation3], 1 }
 0x195   :  { %529 = vsyncpa [#allocation3 + $0x1], 1 }
 0x196   :  { %530 = vsyncpa [#allocation6], 1 }
 0x197   :  { %532 = vsyncpa [#allocation6 + $0x1], 1 }
 0x198   :  { %533 = vsyncpa [#allocation4], 1 }
 0x199   :  { %535 = vsyncpa [#allocation4 + $0x1], 1 }

</bundles_post_ra>
